<compile_context>
chip_gen: v7x
topology: tpu7x:2x2x1
jax: 0.10.0
libtpu: 0.0.40
codegen_flags: <defaults>
</compile_context>

<pallas_src>
import jax
import jax.numpy as jnp
from jax.experimental import pallas as pl
from jax.experimental.pallas import tpu as pltpu


# ---------------------------------------------------------------------------
# Kernels
# ---------------------------------------------------------------------------
def _se_kernel_chw(x_ref, w1t_ref, w2t_ref, o_ref):
    # x block: (Bt, C, HW) with HW on the lane axis. 1/HW is folded into w1t.
    y = jnp.sum(x_ref[...], axis=2)                                  # (Bt, C)
    h = jnp.dot(y, w1t_ref[...], preferred_element_type=jnp.float32)  # (Bt, hidden)
    h = jnp.maximum(h, 0.0)
    s = jnp.dot(h, w2t_ref[...], preferred_element_type=jnp.float32)  # (Bt, C)
    s = jax.nn.sigmoid(s)
    # Re-read the ref for the scale instead of reusing the earlier load; this
    # avoids keeping the whole tile live across the excite chain (no spill).
    o_ref[...] = x_ref[...] * s[:, :, None]


def _se_kernel_hwc(x_ref, w1t_ref, w2t_ref, o_ref):
    # x block: (Bt, HW, C) with C on the lane axis (lane-dense when C%128==0).
    y = jnp.sum(x_ref[...], axis=1)                                  # (Bt, C)
    h = jnp.dot(y, w1t_ref[...], preferred_element_type=jnp.float32)
    h = jnp.maximum(h, 0.0)
    s = jnp.dot(h, w2t_ref[...], preferred_element_type=jnp.float32)
    s = jax.nn.sigmoid(s)
    o_ref[...] = x_ref[...] * s[:, None, :]


# ---------------------------------------------------------------------------
# Hardware-aware tiling helpers
# ---------------------------------------------------------------------------
def _tpu_hw_info():
    """(vmem_capacity_bytes, tensorcores_per_chip) with conservative fallbacks."""
    vmem_cap = 64 << 20          # conservative default (v7x per-TC VMEM)
    num_cores = 1                # v5e / v6e have 1 TC per chip
    try:
        info = pltpu.get_tpu_info()
        vmem_cap = int(getattr(info, "vmem_capacity_bytes", vmem_cap))
        for attr in ("num_cores", "core_count", "tensorcores_per_chip",
                     "num_tensorcores"):
            val = getattr(info, attr, None)
            if val:
                num_cores = int(val)
                break
    except Exception:
        pass
    return max(1 << 20, vmem_cap), max(1, num_cores)


def _choose_batch_tile(B, per_batch_bytes, num_cores,
                       min_tile_bytes=1 << 20, max_tile_bytes=8 << 20,
                       target_steps_per_core=4):
    """Pick Bt (a divisor of B).

    Preferences: tile in [~1 MiB, ~8 MiB] (>=1 MiB keeps ~85% of HBM roofline,
    <=8 MiB bounds VMEM), >= ~4 steps per TensorCore so the DMA pipeline
    overlaps, step count a multiple of the TC count (load balance), and among
    candidates that reach the step target take the largest tile (fewest
    per-step overheads). Tiny problems fall back to one full-size tile."""
    num_cores = max(1, num_cores)
    target_steps = target_steps_per_core * num_cores
    divisors = [d for d in range(1, B + 1) if B % d == 0]

    def size_ok(bt):
        tb = bt * per_batch_bytes
        return (tb >= min_tile_bytes or bt == B) and tb <= max_tile_bytes

    sized = [d for d in divisors if size_ok(d)] or [B]

    def key(bt):
        n = B // bt
        enough = n >= target_steps
        return (
            enough,                       # enough steps to hide DMA
            n % num_cores == 0,           # even split across TensorCores
            -n if enough else n,          # just-enough steps if reachable,
                                          # otherwise as many steps as possible
            bt,                           # then the biggest tile
        )

    return max(sized, key=key)


def _vmem_limit(tile_bytes, weight_bytes, vmem_cap):
    # Residency: 2 pipeline buffers x (input + output) tiles + weights.
    resident = 4 * tile_bytes + 2 * weight_bytes
    limit = resident + resident // 2 + (4 << 20)   # 50% + 4 MiB slack (scratch)
    limit = max(limit, 16 << 20)
    cap = max(16 << 20, int(0.625 * vmem_cap))     # ~40 MiB on a 64 MiB part
    return int(min(limit, cap))


# ---------------------------------------------------------------------------
# Wrapper
# ---------------------------------------------------------------------------
def _run_se(x3, w1t, w2t, kernel):
    """x3: (B, d1, d2) flattened activations; weights already transposed."""
    B, d1, d2 = x3.shape
    per_batch = d1 * d2 * x3.dtype.itemsize

    vmem_cap, num_cores = _tpu_hw_info()
    bt = _choose_batch_tile(B, per_batch, num_cores)
    grid = (B // bt,)

    tile_bytes = bt * per_batch
    weight_bytes = (w1t.size * w1t.dtype.itemsize
                    + w2t.size * w2t.dtype.itemsize)
    vmem_limit = _vmem_limit(tile_bytes, weight_bytes, vmem_cap)

    return pl.pallas_call(
        kernel,
        out_shape=jax.ShapeDtypeStruct((B, d1, d2), x3.dtype),
        grid_spec=pltpu.PrefetchScalarGridSpec(
            num_scalar_prefetch=0,
            grid=grid,
            in_specs=[
                pl.BlockSpec((bt, d1, d2), lambda b: (b, 0, 0)),
                pl.BlockSpec(w1t.shape, lambda b: (0, 0)),
                pl.BlockSpec(w2t.shape, lambda b: (0, 0)),
            ],
            out_specs=pl.BlockSpec((bt, d1, d2), lambda b: (b, 0, 0)),
        ),
        compiler_params=pltpu.CompilerParams(
            dimension_semantics=("parallel",),
            vmem_limit_bytes=vmem_limit),
    )(x3, w1t, w2t)


def se_layer(x, w1, w2):
    """x: (B, C, H, W) float32; w1: (C//r, C); w2: (C, C//r). Returns (B, C, H, W)."""
    B, C, H, W = x.shape
    HW = H * W

    # Pre-transpose the tiny weights once and fold the 1/HW average-pool scale
    # into the first one (scalar commutes through the matmul before the ReLU).
    w1t = jnp.transpose(w1) * (1.0 / HW)            # (C, hidden)
    w2t = jnp.transpose(w2)                         # (hidden, C)

    if HW % 128 == 0 or C % 128 != 0:
        # Channel-major layout: HW on the lane axis (lane-dense when HW%128==0;
        # otherwise full-extent blocks are still legal, just partially masked).
        out = _run_se(x.reshape(B, C, HW), w1t, w2t, _se_kernel_chw)
        return out.reshape(B, C, H, W)

    # Channels-last layout for HW % 128 != 0 but C % 128 == 0 (typical 7x7 /
    # 14x14 SE feature maps): C sits on the lane axis so loads/stores are
    # unmasked and lane-dense.
    # TODO(synk): the NCHW<->NHWC transposes run as separate XLA ops; in a real
    # channels-last network the activations arrive in this layout already.
    x_hwc = jnp.transpose(x, (0, 2, 3, 1)).reshape(B, HW, C)
    out = _run_se(x_hwc, w1t, w2t, _se_kernel_hwc)
    return jnp.transpose(out.reshape(B, H, W, C), (0, 3, 1, 2))


def se_layer_ref(x, w1, w2):
    """Pure-JAX reference mirroring the PyTorch module."""
    y = jnp.mean(x, axis=(2, 3))                 # (B, C)
    y = jnp.maximum(y @ w1.T, 0.0)               # (B, hidden)
    y = jax.nn.sigmoid(y @ w2.T)                 # (B, C)
    return x * y[:, :, None, None]


if __name__ == "__main__":
    key = jax.random.PRNGKey(0)

    # --- Test 1: channel-major path (HW % 128 == 0), matches the module demo ---
    B, C, H, W = 2, 32, 16, 16
    reduction = 16
    hidden = C // reduction                      # = 2
    kx, k1, k2, key = jax.random.split(key, 4)
    x = jax.random.normal(kx, (B, C, H, W), dtype=jnp.float32)
    w1 = jax.random.normal(k1, (hidden, C), dtype=jnp.float32) * 0.1   # Linear(C, C//r)
    w2 = jax.random.normal(k2, (C, hidden), dtype=jnp.float32) * 0.1   # Linear(C//r, C)

    out = jax.block_until_ready(se_layer(x, w1, w2))
    ref = se_layer_ref(x, w1, w2)
    assert out.shape == (B, C, H, W)
    assert jnp.allclose(out, ref, atol=1e-5, rtol=1e-5), "mismatch vs reference (CHW path)"

    # --- Test 2: channels-last path (HW % 128 != 0, C % 128 == 0) ---
    B2, C2, H2, W2 = 2, 128, 7, 7
    hidden2 = C2 // reduction                    # = 8
    kx2, k3, k4, key = jax.random.split(key, 4)
    x2 = jax.random.normal(kx2, (B2, C2, H2, W2), dtype=jnp.float32)
    w1b = jax.random.normal(k3, (hidden2, C2), dtype=jnp.float32) * 0.1
    w2b = jax.random.normal(k4, (C2, hidden2), dtype=jnp.float32) * 0.1

    out2 = jax.block_until_ready(se_layer(x2, w1b, w2b))
    ref2 = se_layer_ref(x2, w1b, w2b)
    assert out2.shape == (B2, C2, H2, W2)
    assert jnp.allclose(out2, ref2, atol=1e-5, rtol=1e-5), "mismatch vs reference (HWC path)"

    print("KERNEL_OK")
</pallas_src>

<mosaic_0001>
module attributes {stable_mosaic.version = 11 : i64} {
  func.func @_se_kernel_chw(%arg0: i32, %arg1: memref<2x32x256xf32, #tpu.memory_space<vmem>>, %arg2: memref<32x2xf32, #tpu.memory_space<vmem>>, %arg3: memref<2x32xf32, #tpu.memory_space<vmem>>, %arg4: memref<2x32x256xf32, #tpu.memory_space<vmem>>) attributes {dimension_semantics = [#tpu.dimension_semantics<parallel>], iteration_bounds = array<i64: 1>, scalar_prefetch = 0 : i64, scratch_operands = 0 : i64, tpu.core_type = #tpu.core_type<tc>, window_params = [{transform_indices = @transform_0, window_bounds = array<i64: 2, 32, 256>}, {pipeline_mode = #tpu.pipeline_mode<synchronous>, transform_indices = @transform_1, window_bounds = array<i64: 32, 2>}, {pipeline_mode = #tpu.pipeline_mode<synchronous>, transform_indices = @transform_2, window_bounds = array<i64: 2, 32>}, {transform_indices = @transform_3, window_bounds = array<i64: 2, 32, 256>}]} {
    %c0 = arith.constant 0 : index
    %c0_0 = arith.constant 0 : index
    %c0_1 = arith.constant 0 : index
    %0 = vector.load %arg1[%c0, %c0_0, %c0_1] : memref<2x32x256xf32, #tpu.memory_space<vmem>>, vector<2x32x256xf32>
    %cst = arith.constant dense<0.000000e+00> : vector<2x32xf32>
    %1 = vector.multi_reduction <add>, %0, %cst [2] : vector<2x32x256xf32> to vector<2x32xf32>
    %c0_2 = arith.constant 0 : index
    %c0_3 = arith.constant 0 : index
    %2 = vector.load %arg2[%c0_2, %c0_3] : memref<32x2xf32, #tpu.memory_space<vmem>>, vector<32x2xf32>
    %cst_4 = arith.constant dense<0.000000e+00> : vector<2x2xf32>
    %3 = tpu.matmul %1, %2, %cst_4 {dimension_numbers = #tpu.dot_dimension_numbers<[1], [0], [0], [1], [0, 0, 1, 1], [], []>} : vector<2x32xf32>, vector<32x2xf32>, vector<2x2xf32> -> vector<2x2xf32>
    %cst_5 = arith.constant 0.000000e+00 : f32
    %4 = vector.broadcast %cst_5 : f32 to vector<2x2xf32>
    %5 = arith.maximumf %3, %4 : vector<2x2xf32>
    %c0_6 = arith.constant 0 : index
    %c0_7 = arith.constant 0 : index
    %6 = vector.load %arg3[%c0_6, %c0_7] : memref<2x32xf32, #tpu.memory_space<vmem>>, vector<2x32xf32>
    %cst_8 = arith.constant dense<0.000000e+00> : vector<2x32xf32>
    %7 = tpu.matmul %5, %6, %cst_8 {dimension_numbers = #tpu.dot_dimension_numbers<[1], [0], [0], [1], [0, 0, 1, 1], [], []>} : vector<2x2xf32>, vector<2x32xf32>, vector<2x32xf32> -> vector<2x32xf32>
    %8 = arith.negf %7 : vector<2x32xf32>
    %9 = math.exp %8 : vector<2x32xf32>
    %cst_9 = arith.constant 1.000000e+00 : f32
    %10 = vector.broadcast %cst_9 : f32 to vector<2x32xf32>
    %11 = arith.addf %10, %9 : vector<2x32xf32>
    %12 = arith.divf %10, %11 : vector<2x32xf32>
    %c0_10 = arith.constant 0 : index
    %c0_11 = arith.constant 0 : index
    %c0_12 = arith.constant 0 : index
    %13 = vector.load %arg1[%c0_10, %c0_11, %c0_12] : memref<2x32x256xf32, #tpu.memory_space<vmem>>, vector<2x32x256xf32>
    %14 = vector.shape_cast %12 : vector<2x32xf32> to vector<2x32x1xf32>
    %15 = vector.broadcast %14 : vector<2x32x1xf32> to vector<2x32x256xf32>
    %16 = arith.mulf %13, %15 : vector<2x32x256xf32>
    %c0_13 = arith.constant 0 : index
    %c0_14 = arith.constant 0 : index
    %c0_15 = arith.constant 0 : index
    %17 = vector.load %arg4[%c0_13, %c0_14, %c0_15] : memref<2x32x256xf32, #tpu.memory_space<vmem>>, vector<2x32x256xf32>
    tpu.vector_store %arg4[%c0_13, %c0_14, %c0_15], %16 {strides = array<i32>} : memref<2x32x256xf32, #tpu.memory_space<vmem>>, vector<2x32x256xf32>,
    return
  }
  func.func @transform_0(%arg0: i32) -> (i32, i32, i32) {
    %c0_i32 = arith.constant 0 : i32
    %c0_i32_0 = arith.constant 0 : i32
    %c0_i32_1 = arith.constant 0 : i32
    return %arg0, %c0_i32, %c0_i32_0 : i32, i32, i32
  }
  func.func @transform_1(%arg0: i32) -> (i32, i32) {
    %c0_i32 = arith.constant 0 : i32
    %c0_i32_0 = arith.constant 0 : i32
    %c0_i32_1 = arith.constant 0 : i32
    return %c0_i32, %c0_i32_0 : i32, i32
  }
  func.func @transform_2(%arg0: i32) -> (i32, i32) {
    %c0_i32 = arith.constant 0 : i32
    %c0_i32_0 = arith.constant 0 : i32
    %c0_i32_1 = arith.constant 0 : i32
    return %c0_i32, %c0_i32_0 : i32, i32
  }
  func.func @transform_3(%arg0: i32) -> (i32, i32, i32) {
    %c0_i32 = arith.constant 0 : i32
    %c0_i32_0 = arith.constant 0 : i32
    %c0_i32_1 = arith.constant 0 : i32
    return %arg0, %c0_i32, %c0_i32_0 : i32, i32, i32
  }
}

</mosaic_0001>

<bundles_post_ra>
// kernel: tpu_custom_call.1
= control target key start
LH: loop header
LB: loop body
LE: loop exit
PB: predicated region body
PF: predicated region fallthrough
CT: control target
= control target key end

     0   :  { %8 = vsyncpa [#allocation3], 0  ;;  %s603_s0 = inlined_call_operand.hbm [shape: f32[2,32,256], index: 0, kind: input, shape index: {}]   ;;  %s604_s1 = inlined_call_operand.vmem [shape: f32[32,2], index: 1, kind: input, shape index: {}]   ;;  %s605_s2 = inlined_call_operand.vmem [shape: f32[2,32], index: 2, kind: input, shape index: {}]   ;;  %s606_s3 = inlined_call_operand.hbm [shape: f32[2,32,256], index: 3, kind: output, shape index: {}]  }
   0x1   :  { %9 = vsyncpa [#allocation4], 0  ;;  %s467_s12 = smov [#allocation2]   ;;  %s419_s16 = scalar_lea.hbm %s603_s0, 2048 }
   0x2   :  { %s15_s13 = sshll.u32 %s467_s12, 4  ;;  %p420_p0 = scmp.ne.s32.totalorder %s603_s0, %s419_s16  ;;  %s16_s13 = int_to_ptr.vmem [resolvable:$true] %s15_s13 }
   0x3   :  { %p423_p1 = scmp.lt.u32.totalorder %s419_s16, %s603_s0 }
   0x5   :  { %p425_p2 = pnand %p423_p1, %p420_p0 }
   0x7   :  { %428 = shalt.err (!%p425_p2)
}
   0x8   :  { %s429_s21 = scalar_lea.vmem %s16_s13, 2048  ;;  %p434_p4 = scmp.lt.s32.totalorder %s16_s13, %s16_s13 }
   0x9   :  { %p430_p3 = scmp.ne.s32.totalorder %s16_s13, %s429_s21  ;;  %p435_p5 = scmp.lt.s32.totalorder %s429_s21, %s429_s21 }
   0xb   :  { %p436_p6 = por %p435_p5, %p434_p4 }
   0xd   :  { %p437_p7 = pnand %p436_p6, %p430_p3 }
   0xf   :  { %440 = shalt.err (!%p437_p7)
}
  0x10   :  { %s468_s22 = smov 256   ;;  %s469_s23 = smov 16  }
  0x11   :  { %21 = dma.hbm_to_vmem [thread:$0]  %s603_s0, 2048, %s16_s13, [#allocation3], %s468_s22, %s468_s22, %s469_s23  }
  0x12   :  { %463 = dma.done.wait [#allocation3], 2048  }
  0x13   :  { %464 = vsyncadd [#allocation3], 4294965248  ;;  %v509_v0 = vld [vmem:[#allocation2 + $0x40] sm:$0xff]  ;;  %v511_v1 = vld [vmem:[#allocation2 + $0x48] sm:$0xff]  ;;  %v470_v27 = vmov 0.0|0.0   ;;  %vm471_vm0 = vmmov 0   ;;  %v81_v32 = vlaneseq }
  0x14   :  { %v513_v2 = vld [vmem:[#allocation2] sm:$0xff]  ;;  %v57_v3 = vadd.f32 %v511_v1, %v509_v0  ;;  %v517_v4 = vld [vmem:[#allocation2 + $0x8] sm:$0xff]  ;;  %v519_v5 = vld [vmem:[#allocation2 + $0x50] sm:$0xff]  ;;  %402 = vmatprep.subr.bf16.mxu0 %v470_v27  ;;  %v472_v31 = vmov 0.0   ;;  %vm92_vm1 = vcmask 130112   ;;  %vm99_vm2 = vcmask 195712  }
  0x15   :  { %v521_v6 = vld [vmem:[#allocation2 + $0x58] sm:$0xff]  ;;  %v45_v7 = vadd.f32 %v517_v4, %v513_v2  ;;  %v525_v8 = vld [vmem:[#allocation2 + $0x10] sm:$0xff]  ;;  %v533_v12 = vld [vmem:[#allocation2 + $0x60] sm:$0xff]  ;;  %394 = vmatprep.mubr.msk.f32.mxu0 %vm471_vm0, %v472_v31  ;;  %397 = vmatprep.subr.mxu1 %v472_v31  ;;  %v82_v33 = vand.u32 127, %v81_v32  ;;  %v84_v38 = vshrl.u32 %v81_v32, 7  ;;  %vm106_vm3 = vcmask 261312  }
  0x16   :  { %v527_v9 = vld [vmem:[#allocation2 + $0x18] sm:$0xff]  ;;  %58 = vadd.xlane.f32.xlu1 %v57_v3  ;;  %v60_v10 = vadd.f32 %v521_v6, %v519_v5  ;;  %v535_v13 = vld [vmem:[#allocation2 + $0x68] sm:$0xff]  ;;  %v537_v14 = vld [vmem:[#allocation2 + $0x20] sm:$0xff]  ;;  %399 = vmatprep.mubr.msk.f32.mxu1 %vm471_vm0, %v472_v31  ;;  %vm127_vm4 = vcmask 1041409   ;;  %vm129_vm5 = vcmask 261120   ;;  %vm208_vm6 = vcmask 1041408  }
  0x17   :  { %46 = vadd.xlane.f32.xlu0 %v45_v7  ;;  %v48_v11 = vadd.f32 %v527_v9, %v525_v8  ;;  %v539_v15 = vld [vmem:[#allocation2 + $0x28] sm:$0xff]  ;;  %v63_v16 = vadd.f32 %v535_v13, %v533_v12  ;;  %v545_v18 = vld [vmem:[#allocation2 + $0x70] sm:$0xff]  ;;  %v547_v19 = vld [vmem:[#allocation2 + $0x78] sm:$0xff]  ;;  %v87_v36 = vadd.s32 4294967288, %v82_v33  ;;  %v94_v37 = vadd.s32 4294967280, %v82_v33 }
  0x18   :  { %v51_v17 = vadd.f32 %v539_v15, %v537_v14  ;;  %v549_v20 = vld [vmem:[#allocation2 + $0x30] sm:$0xff]  ;;  %v551_v21 = vld [vmem:[#allocation2 + $0x38] sm:$0xff]  ;;  %v66_v22 = vadd.f32 %v547_v19, %v545_v18  ;;  %v69_v24 = vld [vmem:[%s604_s1] sm:$0xff]  ;;  %v101_v42 = vadd.s32 4294967272, %v82_v33  ;;  %v85_v44 = vsub.s32 %v82_v33, %v84_v38 }
  0x19   :  { %v54_v23 = vadd.f32 %v551_v21, %v549_v20  ;;  %v70_v25 = vld [vmem:[%s604_s1 + $0x8] sm:$0xff]  ;;  %v71_v28 = vld [vmem:[%s604_s1 + $0x10] sm:$0xff]  ;;  %v72_v29 = vld [vmem:[%s604_s1 + $0x18] sm:$0xff]  ;;  %v90_v40 = vsub.s32 %v87_v36, %v84_v38  ;;  %v97_v43 = vsub.s32 %v94_v37, %v84_v38  ;;  %vm204_vm7 = vcmask 15360  }
  0x1a   :  { %61 = vadd.xlane.f32.xlu1 %v60_v10  ;;  %v403_v26 = vpack.c.bf16 %v70_v25, %v69_v24  ;;  %v406_v30 = vpack.c.bf16 %v72_v29, %v71_v28  ;;  %v104_v48 = vsub.s32 %v101_v42, %v84_v38  ;;  %v203_v7 = vld [vmem:[%s605_s2] sm:$0x3]  ;;  %v309_v29 = vsub.s32 1, %v84_v38  ;;  %s473_s2 = smov [#allocation5]  }
  0x1b   :  { %49 = vadd.xlane.f32.xlu0 %v48_v11  ;;  %398 = vmatpush3.msk.msra.mxu1 %vm208_vm6, %v203_v7  ;;  %s363_s7 = sshll.u32 %s473_s2, 4  ;;  %s364_s7 = int_to_ptr.vmem [resolvable:$true] %s363_s7 }
  0x1c   :  { %404 = vmatpush3.bf16.msra.mxu0 %v403_v26  ;;  %v290_v26 = vsub.s32 0, %v84_v38  ;;  %s441_s8 = scalar_lea.vmem %s364_s7, 2048  ;;  %p446_p9 = scmp.lt.s32.totalorder %s364_s7, %s364_s7 }
  0x1d   :  { %405 = vmatprep.subr.bf16.mxu0 %v470_v27  ;;  %p442_p8 = scmp.ne.s32.totalorder %s364_s7, %s441_s8  ;;  %p447_p10 = scmp.lt.s32.totalorder %s441_s8, %s441_s8 }
  0x1e   :  { %64 = vadd.xlane.f32.xlu1 %v63_v16 }
  0x1f   :  { %52 = vadd.xlane.f32.xlu0 %v51_v17  ;;  %p448_p11 = por %p447_p10, %p446_p9 }
  0x20   :  { %407 = vmatpush3.bf16.msra.mxu0 %v406_v30 }
  0x21   :  { %p449_p12 = pnand %p448_p11, %p442_p8 }
  0x22   :  { %67 = vadd.xlane.f32.xlu1 %v66_v22 }
  0x23   :  { %55 = vadd.xlane.f32.xlu0 %v54_v23 }
  0xa3   :  { %v59_v34 = vpop.xlane.xlu1 %58 }
  0xa4   :  { %v47_v35 = vpop.xlane.xlu0 %46  ;;  %v111_v51 = vrot.slane %v59_v34, %v85_v44 }
  0xa5   :  { %v86_v53 = vrot.slane %v47_v35, %v85_v44 }
  0xa7   :  { %v62_v39 = vpop.xlane.xlu1 %61 }
  0xa8   :  { %v50_v41 = vpop.xlane.xlu0 %49  ;;  %v115_v46 = vrot.slane %v62_v39, %v90_v40 }
  0xa9   :  { %v91_v49 = vrot.slane %v50_v41, %v90_v40 }
  0xaa   :  { %v116_v55 = vsel %vm92_vm1, %v115_v46, %v111_v51 }
  0xab   :  { %v65_v45 = vpop.xlane.xlu1 %64  ;;  %v93_v58 = vsel %vm92_vm1, %v91_v49, %v86_v53 }
  0xac   :  { %v53_v47 = vpop.xlane.xlu0 %52  ;;  %v120_v50 = vrot.slane %v65_v45, %v97_v43 }
  0xad   :  { %v98_v52 = vrot.slane %v53_v47, %v97_v43 }
  0xae   :  { %v121_v59 = vsel %vm99_vm2, %v120_v50, %v116_v55 }
  0xaf   :  { %v68_v54 = vpop.xlane.xlu1 %67  ;;  %v100_v61 = vsel %vm99_vm2, %v98_v52, %v93_v58 }
  0xb0   :  { %v125_v56 = vrot.slane %v68_v54, %v104_v48  ;;  %v56_v57 = vpop.xlane.xlu0 %55 }
  0xb1   :  { %v105_v60 = vrot.slane %v56_v57, %v104_v48 }
  0xb2   :  { %v126_v62 = vsel %vm106_vm3, %v125_v56, %v121_v59 }
  0xb3   :  { %v107_v63 = vsel %vm106_vm3, %v105_v60, %v100_v61 }
  0xb4   :  { %v128_v3 = vsel %vm127_vm4, %v126_v62, %v107_v63 }
  0xb5   :  { %395 = vmatmul.mubr.msk.f32.vlgmr.msra.gmra.mrb[0].mxu0 %vm129_vm5, %v128_v3 }
 0x188   :  { %v198_v10 = vpop.f32.mrb[0].mxu0 }
 0x189   :  { %v202_v11 = vmax.f32 %v198_v10, 0.0  ;;  %v396_v16 = vpop.f32.mrb[1].mxu0 }
 0x18b   :  { %400 = vmatmul.mubr.msk.f32.vlgmr.msra.gmra.mrb[0].mxu1 %vm204_vm7, %v202_v11 }
 0x25e   :  { %v278_v17 = vpop.f32.mrb[0].mxu1 }
 0x25f   :  { %v378_v22 = vmul.f32 -1.442695, %v278_v17  ;;  %v401_v23 = vpop.f32.mrb[1].mxu1 }
 0x261   :  { %415 = vpow2.f32 %v378_v22 }
 0x26b   :  { %v416_v24 = vpop.eup %415 }
 0x26c   :  { %v285_v25 = vadd.f32 1.0, %v416_v24 }
 0x26e   :  { %417 = vrcp.f32 %v285_v25 }
 0x278   :  { %v418_v27 = vpop.eup %417 }
 0x279   :  { %v291_v28 = vrot.slane %v418_v27, %v290_v26  ;;  %v310_v30 = vrot.slane %v418_v27, %v309_v29 }
 0x27b   :  { %297 = vbcast.lane.b32.xlu1 %v291_v28, 264  ;;  %293 = vbcast.lane.b32.xlu0 %v291_v28, 256 }
 0x27f   :  { %301 = vbcast.lane.b32.xlu1 %v291_v28, 272  ;;  %312 = vbcast.lane.b32.xlu0 %v310_v30, 256 }
 0x283   :  { %305 = vbcast.lane.b32.xlu1 %v291_v28, 280  ;;  %320 = vbcast.lane.b32.xlu0 %v310_v30, 272 }
 0x287   :  { %316 = vbcast.lane.b32.xlu1 %v310_v30, 264 }
 0x28b   :  { %324 = vbcast.lane.b32.xlu1 %v310_v30, 280 }
 0x2ed   :  { %v298_v31 = vpop.permute.xlu1 %297  ;;  %v294_v32 = vpop.permute.xlu0 %293 }
 0x2ee   :  { %v328_v33 = vmul.f32 %v298_v31, %v525_v8  ;;  %v329_v34 = vmul.f32 %v298_v31, %v527_v9  ;;  %v326_v35 = vmul.f32 %v294_v32, %v513_v2  ;;  %v327_v36 = vmul.f32 %v294_v32, %v517_v4 }
 0x2f0   :  { %344 = vst [vmem:[#allocation5 + $0x10] sm:$0xff] %v328_v33  ;;  %345 = vst [vmem:[#allocation5 + $0x18] sm:$0xff] %v329_v34 }
 0x2f1   :  { %342 = vst [vmem:[#allocation5] sm:$0xff] %v326_v35  ;;  %343 = vst [vmem:[#allocation5 + $0x8] sm:$0xff] %v327_v36  ;;  %v302_v37 = vpop.permute.xlu1 %301  ;;  %v313_v38 = vpop.permute.xlu0 %312 }
 0x2f2   :  { %v330_v39 = vmul.f32 %v302_v37, %v537_v14  ;;  %v331_v40 = vmul.f32 %v302_v37, %v539_v15  ;;  %v334_v41 = vmul.f32 %v313_v38, %v509_v0  ;;  %v335_v8 = vmul.f32 %v313_v38, %v511_v1 }
 0x2f4   :  { %346 = vst [vmem:[#allocation5 + $0x20] sm:$0xff] %v330_v39  ;;  %347 = vst [vmem:[#allocation5 + $0x28] sm:$0xff] %v331_v40 }
 0x2f5   :  { %350 = vst [vmem:[#allocation5 + $0x40] sm:$0xff] %v334_v41  ;;  %351 = vst [vmem:[#allocation5 + $0x48] sm:$0xff] %v335_v8  ;;  %v306_v2 = vpop.permute.xlu1 %305  ;;  %v321_v4 = vpop.permute.xlu0 %320 }
 0x2f6   :  { %v332_v9 = vmul.f32 %v306_v2, %v549_v20  ;;  %v333_v42 = vmul.f32 %v306_v2, %v551_v21  ;;  %v338_v43 = vmul.f32 %v321_v4, %v533_v12  ;;  %v339_v14 = vmul.f32 %v321_v4, %v535_v13 }
 0x2f8   :  { %348 = vst [vmem:[#allocation5 + $0x30] sm:$0xff] %v332_v9  ;;  %349 = vst [vmem:[#allocation5 + $0x38] sm:$0xff] %v333_v42 }
 0x2f9   :  { %354 = vst [vmem:[#allocation5 + $0x60] sm:$0xff] %v338_v43  ;;  %355 = vst [vmem:[#allocation5 + $0x68] sm:$0xff] %v339_v14  ;;  %v317_v0 = vpop.permute.xlu1 %316 }
 0x2fa   :  { %v336_v1 = vmul.f32 %v317_v0, %v519_v5  ;;  %v337_v15 = vmul.f32 %v317_v0, %v521_v6 }
 0x2fc   :  { %352 = vst [vmem:[#allocation5 + $0x50] sm:$0xff] %v336_v1  ;;  %353 = vst [vmem:[#allocation5 + $0x58] sm:$0xff] %v337_v15 }
 0x2fd   :  { %v325_v20 = vpop.permute.xlu1 %324 }
 0x2fe   :  { %v340_v21 = vmul.f32 %v325_v20, %v545_v18  ;;  %v341_v12 = vmul.f32 %v325_v20, %v547_v19 }
 0x300   :  { %356 = vst [vmem:[#allocation5 + $0x70] sm:$0xff] %v340_v21  ;;  %357 = vst [vmem:[#allocation5 + $0x78] sm:$0xff] %v341_v12 }
 0x301   :  { %452 = shalt.err (!%p449_p12)
}
 0x302   :  { %s453_s11 = scalar_lea.hbm %s606_s3, 2048 }
 0x303   :  { %p454_p13 = scmp.ne.s32.totalorder %s606_s3, %s453_s11  ;;  %p457_p0 = scmp.lt.u32.totalorder %s453_s11, %s606_s3 }
 0x305   :  { %p459_p1 = pnand %p457_p0, %p454_p13 }
 0x307   :  { %462 = shalt.err (!%p459_p1)
}
 0x308   :  { %369 = dma.vmem_to_hbm [thread:$0]  %s364_s7, 2048, %s606_s3, [#allocation4], %s468_s22, %s468_s22, %s469_s23  }
 0x309   :  { %465 = dma.done.wait [#allocation4], 2048  }
 0x30a   :  { %466 = vsyncadd [#allocation4], 4294965248 }
 0x30b   :  { %373 = vsyncpa [#allocation3], 1 }
 0x30c   :  { %374 = vsyncpa [#allocation4], 1 }

</bundles_post_ra>
